<compile_context>
chip_gen: v5e
topology: v5e:2x2
jax: 0.10.0
libtpu: 0.0.40
codegen_flags: <defaults>
</compile_context>

<pallas_src>
import functools

import jax
import jax.numpy as jnp
from jax.experimental import pallas as pl
from jax.experimental.pallas import tpu as pltpu


def _round_up(n, m):
    return ((n + m - 1) // m) * m


# ----------------------------------------------------------------------------
# Fused kernel: chain of (matmul + bias + activation) layers on one batch tile
# ----------------------------------------------------------------------------
def _fc_ae_kernel(*refs, acts, latent_idx):
    """refs = (x_ref, w0, b0, w1, b1, ..., out_ref, lat_ref).

    acts: static tuple of "relu" / "sigmoid" / "none" per layer.
    latent_idx: static index of the layer whose output is the latent code.
    Intermediates stay in vregs; only out_ref / lat_ref are written (both
    lane-padded to a multiple of 128 -> unmasked stores).
    """
    n_layers = len(acts)
    x_ref = refs[0]
    wb_refs = refs[1:1 + 2 * n_layers]
    out_ref, lat_ref = refs[1 + 2 * n_layers:]

    h = x_ref[...].astype(jnp.float32)
    for li in range(n_layers):
        w = wb_refs[2 * li][...]          # (Din, Dout) bf16 — BN already folded
        b = wb_refs[2 * li + 1][...]      # (1, Dout) f32
        # bf16 MXU operands, f32 accumulate; epilogue strictly in f32.
        h = jnp.dot(h.astype(w.dtype), w, preferred_element_type=jnp.float32) + b
        act = acts[li]
        if act == "relu":
            h = jnp.maximum(h, 0.0)
        elif act == "sigmoid":
            h = jax.nn.sigmoid(h)         # exp/recip on the EUP slot
        if li == latent_idx:
            lat_ref[...] = h.astype(lat_ref.dtype)
    out_ref[...] = h.astype(out_ref.dtype)


def fc_ae_forward(layers, x, acts, latent_idx, d_lat, d_out, tile_b=512):
    """Run the whole AE in one batch-gridded pallas_call.

    layers: list of {"w": (Din, Dout) bf16, "b": (1, Dout) f32} with BN folded
            and the latent / final layers lane-padded to 128.
    Returns (output with x.shape, latent (B, d_lat))."""
    B = x.shape[0]
    flat = x.reshape(B, -1).astype(jnp.float32)     # == torch flatten(start_dim=1)
    d_in = flat.shape[1]
    assert d_in == d_out, "autoencoder output dim must equal flattened input dim"

    d_out_p = layers[-1]["w"].shape[1]              # lane-padded output width
    d_lat_p = layers[latent_idx]["w"].shape[1]      # lane-padded latent width

    # Batch tiling: tile must be a multiple of 8 (sublane); pad B up to it.
    tb = min(tile_b, _round_up(B, 8))
    b_pad = _round_up(B, tb)
    if b_pad != B:
        flat = jnp.pad(flat, ((0, b_pad - B), (0, 0)))

    flat_args = [flat]
    for lyr in layers:
        flat_args.append(lyr["w"])
        flat_args.append(lyr["b"])

    # Input tile follows the grid; weights/biases are resident (constant index_map).
    in_specs = [pl.BlockSpec((tb, d_in), lambda i: (i, 0))]
    for lyr in layers:
        in_specs.append(pl.BlockSpec(lyr["w"].shape, lambda i: (0, 0)))
        in_specs.append(pl.BlockSpec(lyr["b"].shape, lambda i: (0, 0)))
    out_specs = (pl.BlockSpec((tb, d_out_p), lambda i: (i, 0)),
                 pl.BlockSpec((tb, d_lat_p), lambda i: (i, 0)))

    flops = 2 * b_pad * sum(l["w"].shape[0] * l["w"].shape[1] for l in layers)
    transcendentals = b_pad * d_lat_p if "sigmoid" in acts else 0
    bytes_accessed = (flat.size * flat.dtype.itemsize
                      + b_pad * (d_out_p + d_lat_p) * 4
                      + sum(l["w"].size * l["w"].dtype.itemsize
                            + l["b"].size * l["b"].dtype.itemsize for l in layers))

    kernel = functools.partial(_fc_ae_kernel, acts=acts, latent_idx=latent_idx)
    out_pad, lat_pad = pl.pallas_call(
        kernel,
        grid=(b_pad // tb,),
        out_shape=(jax.ShapeDtypeStruct((b_pad, d_out_p), jnp.float32),
                   jax.ShapeDtypeStruct((b_pad, d_lat_p), jnp.float32)),
        in_specs=in_specs,
        out_specs=out_specs,
        compiler_params=pltpu.CompilerParams(dimension_semantics=("parallel",)),
        cost_estimate=pl.CostEstimate(flops=flops,
                                      transcendentals=transcendentals,
                                      bytes_accessed=bytes_accessed),
    )(*flat_args)

    output = out_pad[:B, :d_in].reshape(x.shape).astype(x.dtype)
    latent = lat_pad[:B, :d_lat].astype(x.dtype)
    return output, latent


fc_ae_forward_jit = jax.jit(
    fc_ae_forward,
    static_argnames=("acts", "latent_idx", "d_lat", "d_out", "tile_b"))


# ----------------------------------------------------------------------------
# Parameter construction (deterministic, mirrors nn.Linear / nn.BatchNorm1d)
# ----------------------------------------------------------------------------
def make_linear_params(key, din, dout):
    kw, kb = jax.random.split(key)
    bound = 1.0 / jnp.sqrt(din)
    w = jax.random.uniform(kw, (dout, din), jnp.float32, -bound, bound)
    b = jax.random.uniform(kb, (dout,), jnp.float32, -bound, bound)
    return {"w": w, "b": b}


def make_bn_params(key, dim, eps=1e-5):
    kg, kb, km, kv = jax.random.split(key, 4)
    gamma = 1.0 + 0.1 * jax.random.normal(kg, (dim,), jnp.float32)
    beta = 0.1 * jax.random.normal(kb, (dim,), jnp.float32)
    rmean = 0.1 * jax.random.normal(km, (dim,), jnp.float32)
    rvar = 0.5 + jnp.abs(jax.random.normal(kv, (dim,), jnp.float32))
    # fold eval-mode BN into affine scale/shift
    scale = gamma / jnp.sqrt(rvar + eps)
    shift = beta - rmean * scale
    return {"scale": scale, "shift": shift}


def build_fc_ae_raw_params(key, input_channels, window_size, hidden_sizes):
    sizes = [input_channels * window_size] + list(hidden_sizes)
    raw = {"enc": [], "dec": []}
    # encoder: (Linear, BN, ReLU) for i in 0..len(sizes)-3, then Linear(-2,-1)
    for i in range(len(sizes) - 2):
        key, k1, k2 = jax.random.split(key, 3)
        raw["enc"].append({"lin": make_linear_params(k1, sizes[i], sizes[i + 1]),
                           "bn": make_bn_params(k2, sizes[i + 1])})
    key, k1 = jax.random.split(key)
    raw["enc_last"] = make_linear_params(k1, sizes[-2], sizes[-1])
    # decoder: (Linear, BN, ReLU) for i in len(sizes)-1 .. 2, then Linear(1,0)
    for i in range(len(sizes) - 1, 1, -1):
        key, k1, k2 = jax.random.split(key, 3)
        raw["dec"].append({"lin": make_linear_params(k1, sizes[i], sizes[i - 1]),
                           "bn": make_bn_params(k2, sizes[i - 1])})
    key, k1 = jax.random.split(key)
    raw["dec_last"] = make_linear_params(k1, sizes[1], sizes[0])
    return raw


def prepare_fused_layers(raw, latent_sigmoid=True, compute_dtype=jnp.bfloat16,
                         lane=128):
    """One-time build step:
       * transpose weights to (Din, Dout) and fold eval-mode BN into W/b,
       * zero-pad the latent layer's Dout and the final layer's Dout up to a
         multiple of 128 lanes (and the following layer's Din rows to match)
         so both kernel stores are lane-dense,
       * store weights in the MXU compute dtype (bf16), biases in f32.
    Returns (layers_pytree, acts_tuple, latent_idx, d_lat, d_out)."""
    def fold(lin, bn):
        w_t = lin["w"].T.astype(jnp.float32)           # (Din, Dout)
        b = lin["b"].astype(jnp.float32)
        if bn is not None:
            w_t = w_t * bn["scale"][None, :]
            b = b * bn["scale"] + bn["shift"]
        return [w_t, b]

    specs, acts = [], []
    for lyr in raw["enc"]:
        specs.append(fold(lyr["lin"], lyr["bn"]))
        acts.append("relu")
        # TODO(synk): nn.Dropout in training mode not modeled (cfg.dropout = 0.0).
    specs.append(fold(raw["enc_last"], None))
    acts.append("sigmoid" if latent_sigmoid else "none")
    latent_idx = len(specs) - 1
    d_lat = specs[latent_idx][0].shape[1]
    for lyr in raw["dec"]:
        specs.append(fold(lyr["lin"], lyr["bn"]))
        acts.append("relu")
    specs.append(fold(raw["dec_last"], None))
    acts.append("none")
    d_out = specs[-1][0].shape[1]

    def pad_cols(w, b, to):
        pad = to - w.shape[1]
        if pad > 0:
            w = jnp.pad(w, ((0, 0), (0, pad)))
            b = jnp.pad(b, ((0, pad),))
        return w, b

    def pad_rows(w, to):
        pad = to - w.shape[0]
        if pad > 0:
            w = jnp.pad(w, ((0, pad), (0, 0)))
        return w

    # Lane-pad the latent layer output (and the next layer's input rows: padded
    # latent lanes hold sigmoid(0)=0.5, zero weight rows make them contribute 0).
    lat_to = _round_up(d_lat, lane)
    specs[latent_idx][0], specs[latent_idx][1] = pad_cols(
        specs[latent_idx][0], specs[latent_idx][1], lat_to)
    specs[latent_idx + 1][0] = pad_rows(specs[latent_idx + 1][0], lat_to)
    # Lane-pad the final layer output.
    out_to = _round_up(d_out, lane)
    specs[-1][0], specs[-1][1] = pad_cols(specs[-1][0], specs[-1][1], out_to)

    layers = [{"w": w.astype(compute_dtype),
               "b": b.reshape(1, -1).astype(jnp.float32)} for w, b in specs]
    return layers, tuple(acts), latent_idx, d_lat, d_out


# ----------------------------------------------------------------------------
# Pure-JAX reference (unfused, raw f32 params) for validation
# ----------------------------------------------------------------------------
def fc_ae_reference(raw, x, latent_sigmoid=True):
    B = x.shape[0]
    h = x.reshape(B, -1)
    for layer in raw["enc"]:
        h = h @ layer["lin"]["w"].T + layer["lin"]["b"]
        h = jnp.maximum(h * layer["bn"]["scale"] + layer["bn"]["shift"], 0.0)
    latent = h @ raw["enc_last"]["w"].T + raw["enc_last"]["b"]
    if latent_sigmoid:
        latent = jax.nn.sigmoid(latent)
    h = latent
    for layer in raw["dec"]:
        h = h @ layer["lin"]["w"].T + layer["lin"]["b"]
        h = jnp.maximum(h * layer["bn"]["scale"] + layer["bn"]["shift"], 0.0)
    out = (h @ raw["dec_last"]["w"].T + raw["dec_last"]["b"]).reshape(x.shape)
    return out, latent


if __name__ == "__main__":
    # cfg: hidden_sizes=[32, 8], dropout=0.0, latent_sigmoid=True
    input_channels, window_size = 4, 16
    hidden_sizes = [32, 8]
    B = 2

    root = jax.random.PRNGKey(0)
    kx, kp = jax.random.split(root)
    x = jax.random.normal(kx, (B, input_channels, window_size), jnp.float32)

    raw = build_fc_ae_raw_params(kp, input_channels, window_size, hidden_sizes)
    layers, acts, latent_idx, d_lat, d_out = prepare_fused_layers(
        raw, latent_sigmoid=True)
    layers = jax.tree_util.tree_map(jax.block_until_ready, layers)

    output, latent = fc_ae_forward_jit(layers, x, acts, latent_idx, d_lat, d_out)
    output = jax.block_until_ready(output)
    latent = jax.block_until_ready(latent)

    ref_out, ref_lat = fc_ae_reference(raw, x, latent_sigmoid=True)
    assert output.shape == x.shape and latent.shape == (B, hidden_sizes[-1])
    # bf16 MXU operands -> loosened tolerance vs the f32 reference.
    assert jnp.allclose(output, ref_out, atol=5e-2, rtol=5e-2), (
        float(jnp.max(jnp.abs(output - ref_out))))
    assert jnp.allclose(latent, ref_lat, atol=5e-2, rtol=5e-2), (
        float(jnp.max(jnp.abs(latent - ref_lat))))
    print("KERNEL_OK")
</pallas_src>

<mosaic_0001>
module attributes {stable_mosaic.version = 11 : i64} {
  func.func @_fc_ae_kernel(%arg0: i32, %arg1: memref<8x64xf32, #tpu.memory_space<vmem>>, %arg2: memref<64x32xbf16, #tpu.memory_space<vmem>>, %arg3: memref<1x32xf32, #tpu.memory_space<vmem>>, %arg4: memref<32x128xbf16, #tpu.memory_space<vmem>>, %arg5: memref<1x128xf32, #tpu.memory_space<vmem>>, %arg6: memref<128x32xbf16, #tpu.memory_space<vmem>>, %arg7: memref<1x32xf32, #tpu.memory_space<vmem>>, %arg8: memref<32x128xbf16, #tpu.memory_space<vmem>>, %arg9: memref<1x128xf32, #tpu.memory_space<vmem>>, %arg10: memref<8x128xf32, #tpu.memory_space<vmem>>, %arg11: memref<8x128xf32, #tpu.memory_space<vmem>>) attributes {dimension_semantics = [#tpu.dimension_semantics<parallel>], iteration_bounds = array<i64: 1>, scalar_prefetch = 0 : i64, scratch_operands = 0 : i64, tpu.core_type = #tpu.core_type<tc>, window_params = [{transform_indices = @transform_0, window_bounds = array<i64: 8, 64>}, {pipeline_mode = #tpu.pipeline_mode<synchronous>, transform_indices = @transform_1, window_bounds = array<i64: 64, 32>}, {pipeline_mode = #tpu.pipeline_mode<synchronous>, transform_indices = @transform_2, window_bounds = array<i64: 1, 32>}, {pipeline_mode = #tpu.pipeline_mode<synchronous>, transform_indices = @transform_3, window_bounds = array<i64: 32, 128>}, {pipeline_mode = #tpu.pipeline_mode<synchronous>, transform_indices = @transform_4, window_bounds = array<i64: 1, 128>}, {pipeline_mode = #tpu.pipeline_mode<synchronous>, transform_indices = @transform_5, window_bounds = array<i64: 128, 32>}, {pipeline_mode = #tpu.pipeline_mode<synchronous>, transform_indices = @transform_6, window_bounds = array<i64: 1, 32>}, {pipeline_mode = #tpu.pipeline_mode<synchronous>, transform_indices = @transform_7, window_bounds = array<i64: 32, 128>}, {pipeline_mode = #tpu.pipeline_mode<synchronous>, transform_indices = @transform_8, window_bounds = array<i64: 1, 128>}, {transform_indices = @transform_9, window_bounds = array<i64: 8, 128>}, {transform_indices = @transform_10, window_bounds = array<i64: 8, 128>}]} {
    %c0 = arith.constant 0 : index
    %c0_0 = arith.constant 0 : index
    %0 = vector.load %arg1[%c0, %c0_0] : memref<8x64xf32, #tpu.memory_space<vmem>>, vector<8x64xf32>
    %c0_1 = arith.constant 0 : index
    %c0_2 = arith.constant 0 : index
    %1 = vector.load %arg2[%c0_1, %c0_2] : memref<64x32xbf16, #tpu.memory_space<vmem>>, vector<64x32xbf16>
    %c0_3 = arith.constant 0 : index
    %c0_4 = arith.constant 0 : index
    %2 = vector.load %arg3[%c0_3, %c0_4] : memref<1x32xf32, #tpu.memory_space<vmem>>, vector<1x32xf32>
    %3 = arith.truncf %0 : vector<8x64xf32> to vector<8x64xbf16>
    %cst = arith.constant dense<0.000000e+00> : vector<8x32xf32>
    %4 = tpu.matmul %3, %1, %cst {dimension_numbers = #tpu.dot_dimension_numbers<[1], [0], [0], [1], [0, 0, 1, 1], [], []>} : vector<8x64xbf16>, vector<64x32xbf16>, vector<8x32xf32> -> vector<8x32xf32>
    %5 = vector.broadcast %2 : vector<1x32xf32> to vector<8x32xf32>
    %6 = arith.addf %4, %5 : vector<8x32xf32>
    %cst_5 = arith.constant 0.000000e+00 : f32
    %7 = vector.broadcast %cst_5 : f32 to vector<8x32xf32>
    %8 = arith.maximumf %6, %7 : vector<8x32xf32>
    %c0_6 = arith.constant 0 : index
    %c0_7 = arith.constant 0 : index
    %9 = vector.load %arg4[%c0_6, %c0_7] : memref<32x128xbf16, #tpu.memory_space<vmem>>, vector<32x128xbf16>
    %c0_8 = arith.constant 0 : index
    %c0_9 = arith.constant 0 : index
    %10 = vector.load %arg5[%c0_8, %c0_9] : memref<1x128xf32, #tpu.memory_space<vmem>>, vector<1x128xf32>
    %11 = arith.truncf %8 : vector<8x32xf32> to vector<8x32xbf16>
    %cst_10 = arith.constant dense<0.000000e+00> : vector<8x128xf32>
    %12 = tpu.matmul %11, %9, %cst_10 {dimension_numbers = #tpu.dot_dimension_numbers<[1], [0], [0], [1], [0, 0, 1, 1], [], []>} : vector<8x32xbf16>, vector<32x128xbf16>, vector<8x128xf32> -> vector<8x128xf32>
    %13 = vector.broadcast %10 : vector<1x128xf32> to vector<8x128xf32>
    %14 = arith.addf %12, %13 : vector<8x128xf32>
    %15 = arith.negf %14 : vector<8x128xf32>
    %16 = math.exp %15 : vector<8x128xf32>
    %cst_11 = arith.constant 1.000000e+00 : f32
    %17 = vector.broadcast %cst_11 : f32 to vector<8x128xf32>
    %18 = arith.addf %17, %16 : vector<8x128xf32>
    %19 = arith.divf %17, %18 : vector<8x128xf32>
    %c0_12 = arith.constant 0 : index
    %c0_13 = arith.constant 0 : index
    %20 = vector.load %arg11[%c0_12, %c0_13] : memref<8x128xf32, #tpu.memory_space<vmem>>, vector<8x128xf32>
    tpu.vector_store %arg11[%c0_12, %c0_13], %19 {strides = array<i32>} : memref<8x128xf32, #tpu.memory_space<vmem>>, vector<8x128xf32>,
    %c0_14 = arith.constant 0 : index
    %c0_15 = arith.constant 0 : index
    %21 = vector.load %arg6[%c0_14, %c0_15] : memref<128x32xbf16, #tpu.memory_space<vmem>>, vector<128x32xbf16>
    %c0_16 = arith.constant 0 : index
    %c0_17 = arith.constant 0 : index
    %22 = vector.load %arg7[%c0_16, %c0_17] : memref<1x32xf32, #tpu.memory_space<vmem>>, vector<1x32xf32>
    %23 = arith.truncf %19 : vector<8x128xf32> to vector<8x128xbf16>
    %cst_18 = arith.constant dense<0.000000e+00> : vector<8x32xf32>
    %24 = tpu.matmul %23, %21, %cst_18 {dimension_numbers = #tpu.dot_dimension_numbers<[1], [0], [0], [1], [0, 0, 1, 1], [], []>} : vector<8x128xbf16>, vector<128x32xbf16>, vector<8x32xf32> -> vector<8x32xf32>
    %25 = vector.broadcast %22 : vector<1x32xf32> to vector<8x32xf32>
    %26 = arith.addf %24, %25 : vector<8x32xf32>
    %cst_19 = arith.constant 0.000000e+00 : f32
    %27 = vector.broadcast %cst_19 : f32 to vector<8x32xf32>
    %28 = arith.maximumf %26, %27 : vector<8x32xf32>
    %c0_20 = arith.constant 0 : index
    %c0_21 = arith.constant 0 : index
    %29 = vector.load %arg8[%c0_20, %c0_21] : memref<32x128xbf16, #tpu.memory_space<vmem>>, vector<32x128xbf16>
    %c0_22 = arith.constant 0 : index
    %c0_23 = arith.constant 0 : index
    %30 = vector.load %arg9[%c0_22, %c0_23] : memref<1x128xf32, #tpu.memory_space<vmem>>, vector<1x128xf32>
    %31 = arith.truncf %28 : vector<8x32xf32> to vector<8x32xbf16>
    %cst_24 = arith.constant dense<0.000000e+00> : vector<8x128xf32>
    %32 = tpu.matmul %31, %29, %cst_24 {dimension_numbers = #tpu.dot_dimension_numbers<[1], [0], [0], [1], [0, 0, 1, 1], [], []>} : vector<8x32xbf16>, vector<32x128xbf16>, vector<8x128xf32> -> vector<8x128xf32>
    %33 = vector.broadcast %30 : vector<1x128xf32> to vector<8x128xf32>
    %34 = arith.addf %32, %33 : vector<8x128xf32>
    %c0_25 = arith.constant 0 : index
    %c0_26 = arith.constant 0 : index
    %35 = vector.load %arg10[%c0_25, %c0_26] : memref<8x128xf32, #tpu.memory_space<vmem>>, vector<8x128xf32>
    tpu.vector_store %arg10[%c0_25, %c0_26], %34 {strides = array<i32>} : memref<8x128xf32, #tpu.memory_space<vmem>>, vector<8x128xf32>,
    return
  }
  func.func @transform_0(%arg0: i32) -> (i32, i32) {
    %c0_i32 = arith.constant 0 : i32
    %c0_i32_0 = arith.constant 0 : i32
    return %arg0, %c0_i32 : i32, i32
  }
  func.func @transform_1(%arg0: i32) -> (i32, i32) {
    %c0_i32 = arith.constant 0 : i32
    %c0_i32_0 = arith.constant 0 : i32
    %c0_i32_1 = arith.constant 0 : i32
    return %c0_i32, %c0_i32_0 : i32, i32
  }
  func.func @transform_2(%arg0: i32) -> (i32, i32) {
    %c0_i32 = arith.constant 0 : i32
    %c0_i32_0 = arith.constant 0 : i32
    %c0_i32_1 = arith.constant 0 : i32
    return %c0_i32, %c0_i32_0 : i32, i32
  }
  func.func @transform_3(%arg0: i32) -> (i32, i32) {
    %c0_i32 = arith.constant 0 : i32
    %c0_i32_0 = arith.constant 0 : i32
    %c0_i32_1 = arith.constant 0 : i32
    return %c0_i32, %c0_i32_0 : i32, i32
  }
  func.func @transform_4(%arg0: i32) -> (i32, i32) {
    %c0_i32 = arith.constant 0 : i32
    %c0_i32_0 = arith.constant 0 : i32
    %c0_i32_1 = arith.constant 0 : i32
    return %c0_i32, %c0_i32_0 : i32, i32
  }
  func.func @transform_5(%arg0: i32) -> (i32, i32) {
    %c0_i32 = arith.constant 0 : i32
    %c0_i32_0 = arith.constant 0 : i32
    %c0_i32_1 = arith.constant 0 : i32
    return %c0_i32, %c0_i32_0 : i32, i32
  }
  func.func @transform_6(%arg0: i32) -> (i32, i32) {
    %c0_i32 = arith.constant 0 : i32
    %c0_i32_0 = arith.constant 0 : i32
    %c0_i32_1 = arith.constant 0 : i32
    return %c0_i32, %c0_i32_0 : i32, i32
  }
  func.func @transform_7(%arg0: i32) -> (i32, i32) {
    %c0_i32 = arith.constant 0 : i32
    %c0_i32_0 = arith.constant 0 : i32
    %c0_i32_1 = arith.constant 0 : i32
    return %c0_i32, %c0_i32_0 : i32, i32
  }
  func.func @transform_8(%arg0: i32) -> (i32, i32) {
    %c0_i32 = arith.constant 0 : i32
    %c0_i32_0 = arith.constant 0 : i32
    %c0_i32_1 = arith.constant 0 : i32
    return %c0_i32, %c0_i32_0 : i32, i32
  }
  func.func @transform_9(%arg0: i32) -> (i32, i32) {
    %c0_i32 = arith.constant 0 : i32
    %c0_i32_0 = arith.constant 0 : i32
    return %arg0, %c0_i32 : i32, i32
  }
  func.func @transform_10(%arg0: i32) -> (i32, i32) {
    %c0_i32 = arith.constant 0 : i32
    %c0_i32_0 = arith.constant 0 : i32
    return %arg0, %c0_i32 : i32, i32
  }
}

</mosaic_0001>

<bundles_post_ra>
// kernel: fc_ae_forward.1
= control target key start
LH: loop header
LB: loop body
LE: loop exit
PB: predicated region body
PF: predicated region fallthrough
CT: control target
= control target key end

     0   :  { %vm73_vm0 = vcmask 523264   ;;  %vm112_vm1 = vcmask 261120   ;;  %s496_s1 = inlined_call_operand.vmem [shape: bf16[64,32], index: 1, kind: input, shape index: {}]   ;;  %s497_s2 = inlined_call_operand.vmem [shape: f32[1,32], index: 2, kind: input, shape index: {}]   ;;  %s498_s0 = inlined_call_operand.vmem [shape: f32[8,64], index: 0, kind: input, shape index: {}]   ;;  %s499_s4 = inlined_call_operand.vmem [shape: f32[1,128], index: 4, kind: input, shape index: {}]   ;;  %s500_s3 = inlined_call_operand.vmem [shape: bf16[32,128], index: 3, kind: input, shape index: {}]   ;;  %s501_s6 = inlined_call_operand.vmem [shape: f32[1,32], index: 6, kind: input, shape index: {}]   ;;  %s502_s5 = inlined_call_operand.vmem [shape: bf16[128,32], index: 5, kind: input, shape index: {}]   ;;  %s503_s10 = inlined_call_operand.vmem [shape: f32[8,128], index: 10, kind: output, shape index: {1}]   ;;  %s504_s8 = inlined_call_operand.vmem [shape: f32[1,128], index: 8, kind: input, shape index: {}]   ;;  %s505_s7 = inlined_call_operand.vmem [shape: bf16[32,128], index: 7, kind: input, shape index: {}]   ;;  %s506_s9 = inlined_call_operand.vmem [shape: f32[8,128], index: 9, kind: output, shape index: {0}]  }
   0x1   :  { %v349_v0 = vld [vmem:[%s496_s1 + $0x18] sm:$0xff]  ;;  %v348_v1 = vld [vmem:[%s496_s1 + $0x10] sm:$0xff]  ;;  %v347_v2 = vld [vmem:[%s496_s1 + $0x8] sm:$0xff] }
   0x2   :  { %81 = vmatpush.bf16.msra.mxu0 %v349_v0  ;;  %v346_v3 = vld [vmem:[%s496_s1] sm:$0xff]  ;;  %v351_v6 = vld [vmem:[%s500_s3 + $0x8] sm:$0xff]  ;;  %v359_v14 = vld [vmem:[%s502_s5 + $0x38] sm:$0xff] }
   0x3   :  { %v35_v4 = vld [vmem:[%s498_s0] sm:$0xff]  ;;  %122 = vmatpush.bf16.msra.mxu1 %v351_v6  ;;  %218 = vmatpush.bf16.msra.mxu2 %v359_v14  ;;  %v358_v15 = vld [vmem:[%s502_s5 + $0x30] sm:$0xff]  ;;  %v357_v16 = vld [vmem:[%s502_s5 + $0x28] sm:$0xff] }
   0x4   :  { %v45_v5 = vpack.c.bf16 %v35_v4, %v35_v4  ;;  %v350_v7 = vld [vmem:[%s500_s3] sm:$0xff]  ;;  %v355_v18 = vld [vmem:[%s502_s5 + $0x18] sm:$0xff]  ;;  %v354_v19 = vld [vmem:[%s502_s5 + $0x10] sm:$0xff] }
   0x5   :  { %v362_v8 = vld [vmem:[%s497_s2] ss:$0 sm:$0xff]  ;;  %v353_v20 = vld [vmem:[%s502_s5 + $0x8] sm:$0xff] }
   0x6   :  { %82 = vmatpush.bf16.msra.mxu0 %v348_v1  ;;  %v356_v17 = vld [vmem:[%s502_s5 + $0x20] sm:$0xff]  ;;  %v361_v40 = vld [vmem:[%s505_s7 + $0x8] sm:$0xff] }
   0x7   :  { %123 = vmatpush.bf16.msra.mxu1 %v350_v7  ;;  %219 = vmatpush.bf16.msra.mxu2 %v358_v15  ;;  %v352_v21 = vld [vmem:[%s502_s5] sm:$0xff] }
   0x8   :  { %v363_v22 = vld [vmem:[%s499_s4] ss:$0 sm:$0xff]  ;;  %262 = vmatpush.bf16.msra.mxu3 %v361_v40 }
   0x9   :  { %v360_v41 = vld [vmem:[%s505_s7] sm:$0xff] }
   0xa   :  { %83 = vmatpush.bf16.msra.mxu0 %v347_v2  ;;  %v364_v42 = vld [vmem:[%s501_s6] ss:$0 sm:$0xff] }
   0xb   :  { %220 = vmatpush.bf16.msra.mxu2 %v357_v16  ;;  %v365_v48 = vld [vmem:[%s504_s8] ss:$0 sm:$0xff] }
   0xc   :  { %263 = vmatpush.bf16.msra.mxu3 %v360_v41 }
   0xe   :  { %84 = vmatpush.bf16.msra.mxu0 %v346_v3 }
   0xf   :  { %221 = vmatpush.bf16.msra.mxu2 %v356_v17 }
  0x11   :  { %294 = vmatmul.msk.bf16.vlgmr.msra.gmra.mxu0 %vm73_vm0, %v45_v5 }
  0x13   :  { %222 = vmatpush.bf16.msra.mxu2 %v355_v18 }
  0x17   :  { %223 = vmatpush.bf16.msra.mxu2 %v354_v19 }
  0x1b   :  { %224 = vmatpush.bf16.msra.mxu2 %v353_v20 }
  0x1f   :  { %225 = vmatpush.bf16.msra.mxu2 %v352_v21 }
  0x8e   :  { %v86_v9 = vpop.f32.mrf.mxu0 }
  0x8f   :  { %v87_v10 = vadd.f32 %v362_v8, %v86_v9 }
  0x91   :  { %v90_v11 = vmax.f32 %v87_v10, 0.0 }
  0x93   :  { %v96_v12 = vpack.c.bf16 %v90_v11, %v90_v11 }
  0x95   :  { %303 = vmatmul.msk.bf16.vlgmr.msra.gmra.mxu1 %vm112_vm1, %v96_v12 }
  0x96   :  { %v88_v13 = vpop.f32.mrf.mxu0 }
 0x112   :  { %v125_v23 = vpop.f32.mrf.mxu1 }
 0x113   :  { %v126_v24 = vadd.f32 %v363_v22, %v125_v23 }
 0x115   :  { %v304_v25 = vmul.f32 -1.442695, %v126_v24 }
 0x117   :  { %366 = vpow2.f32 %v304_v25 }
 0x11a   :  { %v127_v26 = vpop.f32.mrf.mxu1 }
 0x11d   :  { %v367_v27 = vpop.eup %366 }
 0x11e   :  { %v132_v28 = vadd.f32 1.0, %v367_v27 }
 0x120   :  { %368 = vrcp.f32 %v132_v28  ;;  %v144_v32 = vand.u32 2147483648, %v132_v28  ;;  %v142_v34 = vand.u32 2147483647, %v132_v28  ;;  %vm138_vm3 = vweird.f32 %v132_v28 }
 0x122   :  { %v145_v36 = vor.u32 1.1754944e-38, %v144_v32  ;;  %vm143_vm5 = vcmp.eq.f32.partialorder %v142_v34, 8.507059e+37 }
 0x126   :  { %v369_v29 = vpop.eup %368 }
 0x127   :  { %v134_v30 = vmul.f32 %v369_v29, %v132_v28  ;;  %vm139_vm2 = vweird.f32 %v369_v29 }
 0x128   :  { %vm140_vm4 = vmor %vm138_vm3, %vm139_vm2 }
 0x129   :  { %v135_v31 = vsub.f32 1.0, %v134_v30 }
 0x12b   :  { %v136_v33 = vmul.f32 %v369_v29, %v135_v31 }
 0x12d   :  { %v137_v35 = vadd.f32 %v369_v29, %v136_v33 }
 0x12f   :  { %v141_v37 = vsel %vm140_vm4, %v369_v29, %v137_v35 }
 0x130   :  { %v146_v38 = vsel %vm143_vm5, %v145_v36, %v141_v37 }
 0x131   :  { %148 = vst [vmem:[%s503_s10] sm:$0xff] %v146_v38  ;;  %v166_v39 = vpack.c.bf16 %v146_v38, %v146_v38 }
 0x133   :  { %226 = vmatmul.bf16.vlgmr.msra.gmra.mxu2 %v166_v39 }
 0x1b6   :  { %v227_v43 = vpop.f32.mrf.mxu2 }
 0x1b7   :  { %v228_v44 = vadd.f32 %v364_v42, %v227_v43 }
 0x1b9   :  { %v231_v45 = vmax.f32 %v228_v44, 0.0 }
 0x1bb   :  { %v237_v46 = vpack.c.bf16 %v231_v45, %v231_v45 }
 0x1bd   :  { %345 = vmatmul.msk.bf16.vlgmr.msra.gmra.mxu3 %vm112_vm1, %v237_v46 }
 0x1be   :  { %v229_v47 = vpop.f32.mrf.mxu2 }
 0x240   :  { %v265_v49 = vpop.f32.mrf.mxu3 }
 0x241   :  { %v266_v50 = vadd.f32 %v365_v48, %v265_v49 }
 0x243   :  { %269 = vst [vmem:[%s506_s9] sm:$0xff] %v266_v50 }
 0x248   :  { %v267_v51 = vpop.f32.mrf.mxu3 }

</bundles_post_ra>
